<compile_context>
chip_gen: v5e
topology: v5e:2x2
jax: 0.10.0
libtpu: 0.0.40
codegen_flags: <defaults>
</compile_context>

<pallas_src>
import functools

import jax
import jax.numpy as jnp
from jax.experimental import pallas as pl
from jax.experimental.pallas import tpu as pltpu


def _round_up(n, m):
    return (n + m - 1) // m * m


def policy_kernel(x_ref, w1_ref, b1_ref, w2_ref, b2_ref, w3_ref, b3_ref, o_ref):
    # fc1 + relu (bf16 MXU matmul, f32 accumulate / elementwise).
    # x arrives as f32; cast to bf16 in-kernel so the wrapper never re-writes it.
    x = x_ref[...].astype(jnp.bfloat16)
    h1 = jnp.dot(x, w1_ref[...], preferred_element_type=jnp.float32)
    h1 = jnp.maximum(h1 + b1_ref[...], 0.0)

    # fc2 + relu
    h2 = jnp.dot(h1.astype(jnp.bfloat16), w2_ref[...],
                 preferred_element_type=jnp.float32)
    h2 = jnp.maximum(h2 + b2_ref[...], 0.0)

    # fc3 (padded logit columns carry a -1e30 f32 bias -> exp() underflows to 0)
    logits = jnp.dot(h2.astype(jnp.bfloat16), w3_ref[...],
                     preferred_element_type=jnp.float32) + b3_ref[...]

    # Numerically-stable softmax over the last dim. Exact division: rows sum to
    # 1 to f32 precision (approx reciprocal was the previous correctness bug),
    # and one small divide is negligible next to three matmuls.
    m = jnp.max(logits, axis=-1, keepdims=True)
    e = jnp.exp(logits - m)
    denom = jnp.sum(e, axis=-1, keepdims=True)
    o_ref[...] = (e / denom).astype(o_ref.dtype)


def prepare_params(params):
    """One-time lane-dense padding + bf16 cast of the weights.

    Hoisted out of the jitted forward so per-call HBM traffic is just x + out
    + (already bf16, already padded) weights.
    """
    w1, b1 = params["w1"], params["b1"]
    w2, b2 = params["w2"], params["b2"]
    w3, b3 = params["w3"], params["b3"]
    in_size, hid1 = w1.shape
    hid2 = w2.shape[1]
    out_size = w3.shape[1]

    IN_P = _round_up(in_size, 128)
    H1_P = _round_up(hid1, 128)
    H2_P = _round_up(hid2, 128)
    OUT_P = _round_up(out_size, 128)
    NEG = -1e30  # padded logit columns -> zero softmax mass (keep b3 in f32!)

    padded = {
        "w1": jnp.pad(w1, ((0, IN_P - in_size), (0, H1_P - hid1))).astype(jnp.bfloat16),
        "w2": jnp.pad(w2, ((0, H1_P - hid1), (0, H2_P - hid2))).astype(jnp.bfloat16),
        "w3": jnp.pad(w3, ((0, H2_P - hid2), (0, OUT_P - out_size))).astype(jnp.bfloat16),
        "b1": jnp.pad(b1, ((0, 0), (0, H1_P - hid1))).astype(jnp.float32),
        "b2": jnp.pad(b2, ((0, 0), (0, H2_P - hid2))).astype(jnp.float32),
        "b3": jnp.pad(b3, ((0, 0), (0, OUT_P - out_size)),
                      constant_values=NEG).astype(jnp.float32),
    }
    return padded, out_size


def _plan_tiles(B, IN_P, H1_P, H2_P, OUT_P, resident_bytes, tm_max, vmem_budget):
    """Pick batch tile TM and a vmem_limit_bytes from a live-set estimate."""
    B_P = _round_up(max(B, 1), 16)
    tm = min(tm_max, B_P)
    if B_P > 16:
        # >= 2 grid steps so v7x's 2nd TensorCore gets work on the parallel axis.
        tm = min(tm, _round_up((B_P + 1) // 2, 16))

    def live_bytes(t):
        return (2 * t * IN_P * 4                    # double-buffered f32 x tile
                + 2 * t * OUT_P * 4                 # double-buffered f32 out tile
                + t * (H1_P + H2_P + OUT_P) * 4     # f32 activations / temps
                + resident_bytes)                   # single-buffered weights

    while tm > 16 and live_bytes(tm) > vmem_budget:
        tm -= 16
    tm = max(tm, 16)
    B_P = _round_up(B_P, tm)
    vmem_limit = int(min(max(live_bytes(tm) * 1.2, 32 * 1024 * 1024),
                         100 * 1024 * 1024))
    return tm, B_P, vmem_limit


@functools.partial(jax.jit, static_argnames=("out_size", "tm_max", "vmem_budget"))
def simple_policy_network(x, padded, *, out_size, tm_max=512,
                          vmem_budget=48 * 1024 * 1024):
    """x: (B, input_size) float32.  padded: pre-padded bf16 weights / f32 biases."""
    w1, b1 = padded["w1"], padded["b1"]
    w2, b2 = padded["w2"], padded["b2"]
    w3, b3 = padded["w3"], padded["b3"]

    B, in_size = x.shape
    IN_P, H1_P = w1.shape
    H2_P = w2.shape[1]
    OUT_P = w3.shape[1]

    resident_bytes = ((w1.size + w2.size + w3.size) * 2
                      + (b1.size + b2.size + b3.size) * 4)
    TM, B_P, vmem_limit = _plan_tiles(B, IN_P, H1_P, H2_P, OUT_P,
                                      resident_bytes, tm_max, vmem_budget)
    grid = (B_P // TM,)

    # Pad x only (no pre-cast; bf16 cast happens inside the kernel).
    xp = x.astype(jnp.float32)
    if (B_P, IN_P) != (B, in_size):
        xp = jnp.pad(xp, ((0, B_P - B), (0, IN_P - in_size)))

    # Constant index_map + single buffer: weights DMA'd once, resident in VMEM.
    def resident(a):
        return pl.BlockSpec(a.shape, lambda i: (0, 0),
                            pipeline_mode=pl.Buffered(1))

    out_padded = pl.pallas_call(
        policy_kernel,
        out_shape=jax.ShapeDtypeStruct((B_P, OUT_P), jnp.float32),
        grid_spec=pltpu.PrefetchScalarGridSpec(
            num_scalar_prefetch=0,
            grid=grid,
            in_specs=[
                pl.BlockSpec((TM, IN_P), lambda i: (i, 0)),   # x streams
                resident(w1), resident(b1),
                resident(w2), resident(b2),
                resident(w3), resident(b3),
            ],
            out_specs=pl.BlockSpec((TM, OUT_P), lambda i: (i, 0)),
        ),
        compiler_params=pltpu.CompilerParams(
            dimension_semantics=("parallel",),
            vmem_limit_bytes=vmem_limit),
    )(xp, w1, b1, w2, b2, w3, b3)

    return out_padded[:B, :out_size]


def init_params(key, input_size, hidden_size, output_size):
    """Deterministic synthetic init (uniform, roughly matching nn.Linear scale)."""
    ks = jax.random.split(key, 6)

    def lin(kw, kb, fan_in, fan_out):
        bound = 1.0 / (fan_in ** 0.5)
        w = jax.random.uniform(kw, (fan_in, fan_out), jnp.float32, -bound, bound)
        b = jax.random.uniform(kb, (1, fan_out), jnp.float32, -bound, bound)
        return w, b

    w1, b1 = lin(ks[0], ks[1], input_size, hidden_size)
    w2, b2 = lin(ks[2], ks[3], hidden_size, hidden_size)
    w3, b3 = lin(ks[4], ks[5], hidden_size, output_size)
    return {"w1": w1, "b1": b1, "w2": w2, "b2": b2, "w3": w3, "b3": b3}


def reference_forward(x, params):
    h1 = jnp.maximum(x @ params["w1"] + params["b1"], 0.0)
    h2 = jnp.maximum(h1 @ params["w2"] + params["b2"], 0.0)
    logits = h2 @ params["w3"] + params["b3"]
    return jax.nn.softmax(logits, axis=-1)


if __name__ == "__main__":
    key = jax.random.PRNGKey(0)
    k_x, k_p = jax.random.split(key)

    batch = 2
    input_size = 32
    hidden_size = 64
    output_size = 16

    x = jax.random.normal(k_x, (batch, input_size), dtype=jnp.float32)
    params = init_params(k_p, input_size, hidden_size, output_size)

    padded_params, out_size = prepare_params(params)   # one-time (outside jit)

    out = jax.block_until_ready(
        simple_policy_network(x, padded_params, out_size=out_size))
    ref = reference_forward(x, params)

    assert out.shape == (batch, output_size)
    # exact-division softmax -> rows sum to 1 to f32 precision
    assert jnp.allclose(jnp.sum(out, axis=-1), 1.0, atol=1e-5)
    # bf16 matmul operands -> relax tolerance vs the f32 reference
    assert jnp.allclose(out, ref, atol=2e-2, rtol=0.0), float(jnp.max(jnp.abs(out - ref)))

    print("KERNEL_OK")
</pallas_src>

<mosaic_0001>
module attributes {stable_mosaic.version = 11 : i64} {
  func.func @policy_kernel(%arg0: i32, %arg1: memref<16x128xf32, #tpu.memory_space<vmem>>, %arg2: memref<128x128xbf16, #tpu.memory_space<vmem>>, %arg3: memref<1x128xf32, #tpu.memory_space<vmem>>, %arg4: memref<128x128xbf16, #tpu.memory_space<vmem>>, %arg5: memref<1x128xf32, #tpu.memory_space<vmem>>, %arg6: memref<128x128xbf16, #tpu.memory_space<vmem>>, %arg7: memref<1x128xf32, #tpu.memory_space<vmem>>, %arg8: memref<16x128xf32, #tpu.memory_space<vmem>>) attributes {dimension_semantics = [#tpu.dimension_semantics<parallel>], iteration_bounds = array<i64: 1>, scalar_prefetch = 0 : i64, scratch_operands = 0 : i64, tpu.core_type = #tpu.core_type<tc>, window_params = [{transform_indices = @transform_0, window_bounds = array<i64: 16, 128>}, {pipeline_mode = #tpu.pipeline_mode<synchronous>, transform_indices = @transform_1, window_bounds = array<i64: 128, 128>}, {pipeline_mode = #tpu.pipeline_mode<synchronous>, transform_indices = @transform_2, window_bounds = array<i64: 1, 128>}, {pipeline_mode = #tpu.pipeline_mode<synchronous>, transform_indices = @transform_3, window_bounds = array<i64: 128, 128>}, {pipeline_mode = #tpu.pipeline_mode<synchronous>, transform_indices = @transform_4, window_bounds = array<i64: 1, 128>}, {pipeline_mode = #tpu.pipeline_mode<synchronous>, transform_indices = @transform_5, window_bounds = array<i64: 128, 128>}, {pipeline_mode = #tpu.pipeline_mode<synchronous>, transform_indices = @transform_6, window_bounds = array<i64: 1, 128>}, {transform_indices = @transform_7, window_bounds = array<i64: 16, 128>}]} {
    %c0 = arith.constant 0 : index
    %c0_0 = arith.constant 0 : index
    %0 = vector.load %arg1[%c0, %c0_0] : memref<16x128xf32, #tpu.memory_space<vmem>>, vector<16x128xf32>
    %1 = arith.truncf %0 : vector<16x128xf32> to vector<16x128xbf16>
    %c0_1 = arith.constant 0 : index
    %c0_2 = arith.constant 0 : index
    %2 = vector.load %arg2[%c0_1, %c0_2] : memref<128x128xbf16, #tpu.memory_space<vmem>>, vector<128x128xbf16>
    %cst = arith.constant dense<0.000000e+00> : vector<16x128xf32>
    %3 = tpu.matmul %1, %2, %cst {dimension_numbers = #tpu.dot_dimension_numbers<[1], [0], [0], [1], [0, 0, 1, 1], [], []>} : vector<16x128xbf16>, vector<128x128xbf16>, vector<16x128xf32> -> vector<16x128xf32>
    %c0_3 = arith.constant 0 : index
    %c0_4 = arith.constant 0 : index
    %4 = vector.load %arg3[%c0_3, %c0_4] : memref<1x128xf32, #tpu.memory_space<vmem>>, vector<1x128xf32>
    %5 = vector.broadcast %4 : vector<1x128xf32> to vector<16x128xf32>
    %6 = arith.addf %3, %5 : vector<16x128xf32>
    %cst_5 = arith.constant 0.000000e+00 : f32
    %7 = vector.broadcast %cst_5 : f32 to vector<16x128xf32>
    %8 = arith.maximumf %6, %7 : vector<16x128xf32>
    %9 = arith.truncf %8 : vector<16x128xf32> to vector<16x128xbf16>
    %c0_6 = arith.constant 0 : index
    %c0_7 = arith.constant 0 : index
    %10 = vector.load %arg4[%c0_6, %c0_7] : memref<128x128xbf16, #tpu.memory_space<vmem>>, vector<128x128xbf16>
    %cst_8 = arith.constant dense<0.000000e+00> : vector<16x128xf32>
    %11 = tpu.matmul %9, %10, %cst_8 {dimension_numbers = #tpu.dot_dimension_numbers<[1], [0], [0], [1], [0, 0, 1, 1], [], []>} : vector<16x128xbf16>, vector<128x128xbf16>, vector<16x128xf32> -> vector<16x128xf32>
    %c0_9 = arith.constant 0 : index
    %c0_10 = arith.constant 0 : index
    %12 = vector.load %arg5[%c0_9, %c0_10] : memref<1x128xf32, #tpu.memory_space<vmem>>, vector<1x128xf32>
    %13 = vector.broadcast %12 : vector<1x128xf32> to vector<16x128xf32>
    %14 = arith.addf %11, %13 : vector<16x128xf32>
    %cst_11 = arith.constant 0.000000e+00 : f32
    %15 = vector.broadcast %cst_11 : f32 to vector<16x128xf32>
    %16 = arith.maximumf %14, %15 : vector<16x128xf32>
    %17 = arith.truncf %16 : vector<16x128xf32> to vector<16x128xbf16>
    %c0_12 = arith.constant 0 : index
    %c0_13 = arith.constant 0 : index
    %18 = vector.load %arg6[%c0_12, %c0_13] : memref<128x128xbf16, #tpu.memory_space<vmem>>, vector<128x128xbf16>
    %cst_14 = arith.constant dense<0.000000e+00> : vector<16x128xf32>
    %19 = tpu.matmul %17, %18, %cst_14 {dimension_numbers = #tpu.dot_dimension_numbers<[1], [0], [0], [1], [0, 0, 1, 1], [], []>} : vector<16x128xbf16>, vector<128x128xbf16>, vector<16x128xf32> -> vector<16x128xf32>
    %c0_15 = arith.constant 0 : index
    %c0_16 = arith.constant 0 : index
    %20 = vector.load %arg7[%c0_15, %c0_16] : memref<1x128xf32, #tpu.memory_space<vmem>>, vector<1x128xf32>
    %21 = vector.broadcast %20 : vector<1x128xf32> to vector<16x128xf32>
    %22 = arith.addf %19, %21 : vector<16x128xf32>
    %cst_17 = arith.constant dense<0xFF800000> : vector<16xf32>
    %23 = vector.multi_reduction <maximumf>, %22, %cst_17 [1] : vector<16x128xf32> to vector<16xf32>
    %24 = vector.shape_cast %23 : vector<16xf32> to vector<16x1xf32>
    %25 = vector.broadcast %24 : vector<16x1xf32> to vector<16x128xf32>
    %26 = arith.subf %22, %25 : vector<16x128xf32>
    %27 = math.exp %26 : vector<16x128xf32>
    %cst_18 = arith.constant dense<0.000000e+00> : vector<16xf32>
    %28 = vector.multi_reduction <add>, %27, %cst_18 [1] : vector<16x128xf32> to vector<16xf32>
    %29 = vector.shape_cast %28 : vector<16xf32> to vector<16x1xf32>
    %30 = vector.broadcast %29 : vector<16x1xf32> to vector<16x128xf32>
    %31 = arith.divf %27, %30 : vector<16x128xf32>
    %c0_19 = arith.constant 0 : index
    %c0_20 = arith.constant 0 : index
    %32 = vector.load %arg8[%c0_19, %c0_20] : memref<16x128xf32, #tpu.memory_space<vmem>>, vector<16x128xf32>
    tpu.vector_store %arg8[%c0_19, %c0_20], %31 {strides = array<i32>} : memref<16x128xf32, #tpu.memory_space<vmem>>, vector<16x128xf32>,
    return
  }
  func.func @transform_0(%arg0: i32) -> (i32, i32) {
    %c0_i32 = arith.constant 0 : i32
    %c0_i32_0 = arith.constant 0 : i32
    return %arg0, %c0_i32 : i32, i32
  }
  func.func @transform_1(%arg0: i32) -> (i32, i32) {
    %c0_i32 = arith.constant 0 : i32
    %c0_i32_0 = arith.constant 0 : i32
    %c0_i32_1 = arith.constant 0 : i32
    return %c0_i32, %c0_i32_0 : i32, i32
  }
  func.func @transform_2(%arg0: i32) -> (i32, i32) {
    %c0_i32 = arith.constant 0 : i32
    %c0_i32_0 = arith.constant 0 : i32
    %c0_i32_1 = arith.constant 0 : i32
    return %c0_i32, %c0_i32_0 : i32, i32
  }
  func.func @transform_3(%arg0: i32) -> (i32, i32) {
    %c0_i32 = arith.constant 0 : i32
    %c0_i32_0 = arith.constant 0 : i32
    %c0_i32_1 = arith.constant 0 : i32
    return %c0_i32, %c0_i32_0 : i32, i32
  }
  func.func @transform_4(%arg0: i32) -> (i32, i32) {
    %c0_i32 = arith.constant 0 : i32
    %c0_i32_0 = arith.constant 0 : i32
    %c0_i32_1 = arith.constant 0 : i32
    return %c0_i32, %c0_i32_0 : i32, i32
  }
  func.func @transform_5(%arg0: i32) -> (i32, i32) {
    %c0_i32 = arith.constant 0 : i32
    %c0_i32_0 = arith.constant 0 : i32
    %c0_i32_1 = arith.constant 0 : i32
    return %c0_i32, %c0_i32_0 : i32, i32
  }
  func.func @transform_6(%arg0: i32) -> (i32, i32) {
    %c0_i32 = arith.constant 0 : i32
    %c0_i32_0 = arith.constant 0 : i32
    %c0_i32_1 = arith.constant 0 : i32
    return %c0_i32, %c0_i32_0 : i32, i32
  }
  func.func @transform_7(%arg0: i32) -> (i32, i32) {
    %c0_i32 = arith.constant 0 : i32
    %c0_i32_0 = arith.constant 0 : i32
    return %arg0, %c0_i32 : i32, i32
  }
}

</mosaic_0001>

<bundles_post_ra>
// kernel: simple_policy_network.1
= control target key start
LH: loop header
LB: loop body
LE: loop exit
PB: predicated region body
PF: predicated region fallthrough
CT: control target
= control target key end

     0   :  { %12 = vsyncpa [#allocation3], 0  ;;  %s667_s0 = inlined_call_operand.vmem [shape: f32[16,128], index: 0, kind: input, shape index: {}]   ;;  %s668_s1 = inlined_call_operand.hbm [shape: bf16[128,128], index: 1, kind: input, shape index: {}]   ;;  %s669_s2 = inlined_call_operand.vmem [shape: f32[1,128], index: 2, kind: input, shape index: {}]   ;;  %s670_s3 = inlined_call_operand.hbm [shape: bf16[128,128], index: 3, kind: input, shape index: {}]   ;;  %s671_s4 = inlined_call_operand.vmem [shape: f32[1,128], index: 4, kind: input, shape index: {}]   ;;  %s672_s5 = inlined_call_operand.hbm [shape: bf16[128,128], index: 5, kind: input, shape index: {}]   ;;  %s673_s6 = inlined_call_operand.vmem [shape: f32[1,128], index: 6, kind: input, shape index: {}]   ;;  %s674_s7 = inlined_call_operand.vmem [shape: f32[16,128], index: 7, kind: output, shape index: {}]  }
   0x1   :  { %13 = vsyncpa [#allocation5], 0  ;;  %s35_s26 = sshll.u32 %s670_s3, 4  ;;  %s592_s27 = smov [#allocation4]   ;;  %s36_s26 = int_to_ptr.hbm [resolvable:$true] %s35_s26 }
   0x2   :  { %s37_s28 = sshll.u32 %s592_s27, 4  ;;  %s20_s8 = sshll.u32 %s668_s1, 4  ;;  %s38_s28 = int_to_ptr.vmem [resolvable:$true] %s37_s28  ;;  %s21_s8 = int_to_ptr.hbm [resolvable:$true] %s20_s8 }
   0x3   :  { %s593_s9 = smov 64   ;;  %s594_s10 = smov 4  }
   0x4   :  { %43 = dma.hbm_to_vmem [thread:$0]  %s36_s26, 1024, %s38_s28, [#allocation5], %s593_s9, %s593_s9, %s594_s10  }
   0x5   :  { %s595_s11 = smov [#allocation2]   ;;  %s50_s15 = sshll.u32 %s672_s5, 4  ;;  %s51_s15 = int_to_ptr.hbm [resolvable:$true] %s50_s15 }
   0x6   :  { %s22_s12 = sshll.u32 %s595_s11, 4  ;;  %s596_s3 = smov [#allocation6]   ;;  %s23_s12 = int_to_ptr.vmem [resolvable:$true] %s22_s12 }
   0x7   :  { %28 = dma.hbm_to_vmem [thread:$0]  %s21_s8, 1024, %s23_s12, [#allocation3], %s593_s9, %s593_s9, %s594_s10  }
   0x8   :  { %s52_s16 = sshll.u32 %s596_s3, 4  ;;  %s53_s16 = int_to_ptr.vmem [resolvable:$true] %s52_s16 }
   0x9   :  { %58 = dma.hbm_to_vmem [thread:$0]  %s51_s15, 1024, %s53_s16, [#allocation5], %s593_s9, %s593_s9, %s594_s10  }
   0xa   :  { %588 = dma.done.wait [#allocation3], 1024  }
   0xb   :  { %589 = vsyncadd [#allocation3], 4294966272 }
   0xc   :  { %590 = dma.done.wait [#allocation5], 2048  }
   0xd   :  { %591 = vsyncadd [#allocation5], 4294965248  ;;  %v483_v0 = vld [vmem:[#allocation2 + $0x38] sm:$0xff]  ;;  %v482_v1 = vld [vmem:[#allocation2 + $0x30] sm:$0xff] }
   0xe   :  { %144 = vmatpush.bf16.msra.mxu0 %v483_v0  ;;  %v491_v2 = vld [vmem:[#allocation4 + $0x38] sm:$0xff]  ;;  %v490_v3 = vld [vmem:[#allocation4 + $0x30] sm:$0xff]  ;;  %v481_v4 = vld [vmem:[#allocation2 + $0x28] sm:$0xff] }
   0xf   :  { %229 = vmatpush.bf16.msra.mxu1 %v491_v2  ;;  %v489_v5 = vld [vmem:[#allocation4 + $0x28] sm:$0xff]  ;;  %v480_v6 = vld [vmem:[#allocation2 + $0x20] sm:$0xff]  ;;  %v479_v8 = vld [vmem:[#allocation2 + $0x18] sm:$0xff] }
  0x10   :  { %v488_v7 = vld [vmem:[#allocation4 + $0x20] sm:$0xff]  ;;  %v478_v9 = vld [vmem:[#allocation2 + $0x10] sm:$0xff]  ;;  %v477_v10 = vld [vmem:[#allocation2 + $0x8] sm:$0xff] }
  0x11   :  { %v476_v11 = vld [vmem:[#allocation2] sm:$0xff]  ;;  %v74_v13 = vld [vmem:[%s667_s0 + $0x8] sm:$0xff]  ;;  %v487_v15 = vld [vmem:[#allocation4 + $0x18] sm:$0xff] }
  0x12   :  { %145 = vmatpush.bf16.msra.mxu0 %v482_v1  ;;  %v73_v12 = vld [vmem:[%s667_s0] sm:$0xff]  ;;  %v486_v16 = vld [vmem:[#allocation4 + $0x10] sm:$0xff]  ;;  %v485_v17 = vld [vmem:[#allocation4 + $0x8] sm:$0xff] }
  0x13   :  { %230 = vmatpush.bf16.msra.mxu1 %v490_v3  ;;  %v75_v14 = vpack.c.bf16 %v74_v13, %v73_v12  ;;  %v484_v18 = vld [vmem:[#allocation4] sm:$0xff]  ;;  %v499_v19 = vld [vmem:[#allocation6 + $0x38] sm:$0xff]  ;;  %v498_v20 = vld [vmem:[#allocation6 + $0x30] sm:$0xff] }
  0x14   :  { %314 = vmatpush.bf16.msra.mxu2 %v499_v19  ;;  %v497_v21 = vld [vmem:[#allocation6 + $0x28] sm:$0xff]  ;;  %v496_v22 = vld [vmem:[#allocation6 + $0x20] sm:$0xff]  ;;  %v495_v31 = vld [vmem:[#allocation6 + $0x18] sm:$0xff] }
  0x15   :  { %v505_v24 = vld [vmem:[%s669_s2] ss:$0 sm:$0xff]  ;;  %v494_v32 = vld [vmem:[#allocation6 + $0x10] sm:$0xff]  ;;  %v493_v33 = vld [vmem:[#allocation6 + $0x8] sm:$0xff] }
  0x16   :  { %146 = vmatpush.bf16.msra.mxu0 %v481_v4  ;;  %v492_v34 = vld [vmem:[#allocation6] sm:$0xff] }
  0x17   :  { %231 = vmatpush.bf16.msra.mxu1 %v489_v5  ;;  %v506_v36 = vld [vmem:[%s671_s4] ss:$0 sm:$0xff] }
  0x18   :  { %315 = vmatpush.bf16.msra.mxu2 %v498_v20  ;;  %v507_v43 = vld [vmem:[%s673_s6] ss:$0 sm:$0xff] }
  0x1a   :  { %147 = vmatpush.bf16.msra.mxu0 %v480_v6 }
  0x1b   :  { %232 = vmatpush.bf16.msra.mxu1 %v488_v7 }
  0x1c   :  { %316 = vmatpush.bf16.msra.mxu2 %v497_v21 }
  0x1e   :  { %148 = vmatpush.bf16.msra.mxu0 %v479_v8 }
  0x1f   :  { %233 = vmatpush.bf16.msra.mxu1 %v487_v15 }
  0x20   :  { %317 = vmatpush.bf16.msra.mxu2 %v496_v22 }
  0x22   :  { %149 = vmatpush.bf16.msra.mxu0 %v478_v9 }
  0x23   :  { %234 = vmatpush.bf16.msra.mxu1 %v486_v16 }
  0x24   :  { %318 = vmatpush.bf16.msra.mxu2 %v495_v31 }
  0x26   :  { %150 = vmatpush.bf16.msra.mxu0 %v477_v10 }
  0x27   :  { %235 = vmatpush.bf16.msra.mxu1 %v485_v17 }
  0x28   :  { %319 = vmatpush.bf16.msra.mxu2 %v494_v32 }
  0x2a   :  { %151 = vmatpush.bf16.msra.mxu0 %v476_v11 }
  0x2b   :  { %236 = vmatpush.bf16.msra.mxu1 %v484_v18 }
  0x2c   :  { %320 = vmatpush.bf16.msra.mxu2 %v493_v33 }
  0x2d   :  { %152 = vmatmul.bf16.vlgmr.msra.gmra.mxu0 %v75_v14 }
  0x30   :  { %321 = vmatpush.bf16.msra.mxu2 %v492_v34 }
  0xaa   :  { %v153_v23 = vpop.f32.mrf.mxu0 }
  0xab   :  { %v154_v25 = vadd.f32 %v505_v24, %v153_v23 }
  0xad   :  { %v158_v28 = vmax.f32 %v154_v25, 0.0 }
  0xb2   :  { %v155_v26 = vpop.f32.mrf.mxu0 }
  0xb3   :  { %v156_v27 = vadd.f32 %v505_v24, %v155_v26 }
  0xb5   :  { %v159_v29 = vmax.f32 %v156_v27, 0.0 }
  0xb7   :  { %v160_v30 = vpack.c.bf16 %v159_v29, %v158_v28 }
  0xb9   :  { %237 = vmatmul.bf16.vlgmr.msra.gmra.mxu1 %v160_v30 }
 0x136   :  { %v238_v35 = vpop.f32.mrf.mxu1 }
 0x137   :  { %v239_v37 = vadd.f32 %v506_v36, %v238_v35 }
 0x139   :  { %v243_v40 = vmax.f32 %v239_v37, 0.0 }
 0x13e   :  { %v240_v38 = vpop.f32.mrf.mxu1 }
 0x13f   :  { %v241_v39 = vadd.f32 %v506_v36, %v240_v38 }
 0x141   :  { %v244_v41 = vmax.f32 %v241_v39, 0.0 }
 0x143   :  { %v245_v42 = vpack.c.bf16 %v244_v41, %v243_v40 }
 0x145   :  { %322 = vmatmul.bf16.vlgmr.msra.gmra.mxu2 %v245_v42 }
 0x1c8   :  { %v323_v44 = vpop.f32.mrf.mxu2 }
 0x1c9   :  { %v324_v45 = vadd.f32 %v507_v43, %v323_v44 }
 0x1cb   :  { %328 = vmax.xlane.f32.xlu0 %v324_v45 }
 0x1d0   :  { %v325_v46 = vpop.f32.mrf.mxu2 }
 0x1d1   :  { %v326_v47 = vadd.f32 %v507_v43, %v325_v46 }
 0x1d3   :  { %330 = vmax.xlane.f32.xlu0 %v326_v47 }
 0x23e   :  { %v329_v48 = vpop.xlane.xlu0 %328 }
 0x23f   :  { %v332_v49 = vsub.f32 %v324_v45, %v329_v48 }
 0x241   :  { %v334_v50 = vmul.f32 1.442695, %v332_v49 }
 0x243   :  { %508 = vpow2.f32 %v334_v50 }
 0x246   :  { %v331_v51 = vpop.xlane.xlu0 %330 }
 0x247   :  { %v333_v52 = vsub.f32 %v326_v47, %v331_v51 }
 0x249   :  { %v509_v53 = vpop.eup %508  ;;  %v336_v54 = vmul.f32 1.442695, %v333_v52 }
 0x24a   :  { %338 = vadd.xlane.f32.xlu1 %v509_v53 }
 0x24b   :  { %510 = vpow2.f32 %v336_v54 }
 0x251   :  { %v511_v55 = vpop.eup %510 }
 0x252   :  { %340 = vadd.xlane.f32.xlu1 %v511_v55 }
 0x2bd   :  { %v339_v56 = vpop.xlane.xlu1 %338 }
 0x2be   :  { %512 = vrcp.f32 %v339_v56  ;;  %v353_v61 = vand.u32 2147483648, %v339_v56  ;;  %v351_v63 = vand.u32 2147483647, %v339_v56  ;;  %vm347_vm1 = vweird.f32 %v339_v56 }
 0x2c0   :  { %v354_v2 = vor.u32 1.1754944e-38, %v353_v61  ;;  %vm352_vm3 = vcmp.eq.f32.partialorder %v351_v63, 8.507059e+37 }
 0x2c4   :  { %v513_v57 = vpop.eup %512 }
 0x2c5   :  { %v343_v58 = vmul.f32 %v513_v57, %v339_v56  ;;  %v341_v59 = vpop.xlane.xlu1 %340  ;;  %vm348_vm0 = vweird.f32 %v513_v57 }
 0x2c6   :  { %514 = vrcp.f32 %v341_v59  ;;  %vm349_vm2 = vmor %vm347_vm1, %vm348_vm0  ;;  %v368_v8 = vand.u32 2147483648, %v341_v59  ;;  %v366_v10 = vand.u32 2147483647, %v341_v59  ;;  %vm362_vm5 = vweird.f32 %v341_v59 }
 0x2c7   :  { %v344_v60 = vsub.f32 1.0, %v343_v58 }
 0x2c8   :  { %v369_v12 = vor.u32 1.1754944e-38, %v368_v8  ;;  %vm367_vm7 = vcmp.eq.f32.partialorder %v366_v10, 8.507059e+37 }
 0x2c9   :  { %v345_v62 = vmul.f32 %v513_v57, %v344_v60 }
 0x2cb   :  { %v346_v0 = vadd.f32 %v513_v57, %v345_v62 }
 0x2cc   :  { %v515_v1 = vpop.eup %514 }
 0x2cd   :  { %v350_v3 = vsel %vm349_vm2, %v513_v57, %v346_v0  ;;  %v358_v4 = vmul.f32 %v515_v1, %v341_v59  ;;  %vm363_vm4 = vweird.f32 %v515_v1 }
 0x2ce   :  { %v355_v5 = vsel %vm352_vm3, %v354_v2, %v350_v3  ;;  %vm364_vm6 = vmor %vm362_vm5, %vm363_vm4 }
 0x2cf   :  { %v356_v6 = vmul.f32 %v509_v53, %v355_v5  ;;  %v359_v7 = vsub.f32 1.0, %v358_v4 }
 0x2d1   :  { %372 = vst [vmem:[%s674_s7] sm:$0xff] %v356_v6  ;;  %v360_v9 = vmul.f32 %v515_v1, %v359_v7 }
 0x2d3   :  { %v361_v11 = vadd.f32 %v515_v1, %v360_v9 }
 0x2d5   :  { %v365_v13 = vsel %vm364_vm6, %v515_v1, %v361_v11 }
 0x2d6   :  { %v370_v14 = vsel %vm367_vm7, %v369_v12, %v365_v13 }
 0x2d7   :  { %v371_v15 = vmul.f32 %v511_v55, %v370_v14 }
 0x2d9   :  { %373 = vst [vmem:[%s674_s7 + $0x8] sm:$0xff] %v371_v15 }
 0x2da   :  { %378 = vsyncpa [#allocation3], 1 }
 0x2db   :  { %379 = vsyncpa [#allocation5], 1 }

</bundles_post_ra>
